<compile_context>
chip_gen: v6e
topology: v6e:2x2x1
jax: 0.10.0
libtpu: 0.0.40
codegen_flags: <defaults>
</compile_context>

<pallas_src>
from typing import Dict, List, Optional

import jax
import jax.numpy as jnp
from jax.experimental import pallas as pl
from jax.experimental.pallas import tpu as pltpu


OUT_LANES = 128  # lane-dense fused head output: col 0 = energy, cols 1:4 = forces


def _round_up(v: int, m: int) -> int:
    return (v + m - 1) // m * m


# --------------------------------------------------------------------------
# Fused Pallas kernel: representation (linear + SiLU) and linear output heads.
#   x   : [TM, NIN]      (tile of per-atom raw inputs)
#   w1  : [NIN, H]       b1 : [1, H]
#   wout: [H, 128]       (col 0 energy weights, cols 1:4 force weights, rest 0)
#   out : [TM, 128]      lane-dense head block
# --------------------------------------------------------------------------
def _fused_nnp_kernel(x_ref, w1_ref, b1_ref, wout_ref, out_ref):
    x = x_ref[...]                                                  # [TM, NIN]
    h = jnp.dot(x, w1_ref[...], preferred_element_type=jnp.float32) # MXU
    h = h + b1_ref[...]                                             # VPU (broadcast)
    h = h * jax.nn.sigmoid(h)                                       # SiLU (EUP slot)
    out_ref[...] = jnp.dot(h, wout_ref[...],
                           preferred_element_type=jnp.float32)      # MXU, lane-dense


class FusedPotentialCore:
    """Holds representation + head parameters, padded once to TPU-friendly
    shapes, and runs the single fused Pallas kernel over an atom-tiled grid."""

    def __init__(self, w1: jnp.ndarray, b1: jnp.ndarray,
                 w_e: jnp.ndarray, w_f: jnp.ndarray, tile_m: int = 512):
        n_in, hidden = w1.shape
        self.n_in = n_in
        self.hidden = hidden
        # On v7x (64 MiB VMEM/TC) halve tile_m for very large hidden dims.
        self.tile_m = tile_m

        self.nin_p = _round_up(n_in, 128)
        self.h_p = _round_up(hidden, 128)

        self.w1_p = jnp.zeros((self.nin_p, self.h_p), jnp.float32)
        self.w1_p = self.w1_p.at[:n_in, :hidden].set(w1.astype(jnp.float32))
        self.b1_p = jnp.zeros((1, self.h_p), jnp.float32)
        self.b1_p = self.b1_p.at[0, :hidden].set(b1.astype(jnp.float32))
        # Fused, lane-dense head weights.
        wout = jnp.zeros((self.h_p, OUT_LANES), jnp.float32)
        wout = wout.at[:hidden, 0:1].set(w_e.astype(jnp.float32))
        wout = wout.at[:hidden, 1:4].set(w_f.astype(jnp.float32))
        self.wout = wout

    def __call__(self, node_inputs: jnp.ndarray) -> jnp.ndarray:
        n_atoms, n_in = node_inputs.shape
        assert n_in == self.n_in
        nin_p, h_p = self.nin_p, self.h_p

        tm = min(self.tile_m, _round_up(n_atoms, 8))
        n_p = _round_up(n_atoms, tm)

        x_p = jnp.zeros((n_p, nin_p), jnp.float32)
        x_p = x_p.at[:n_atoms, :n_in].set(node_inputs.astype(jnp.float32))

        grid = (n_p // tm,)

        flops = 2 * n_p * nin_p * h_p + 2 * n_p * h_p * OUT_LANES
        bytes_accessed = 4 * (n_p * nin_p + nin_p * h_p + h_p
                              + h_p * OUT_LANES + n_p * OUT_LANES)

        # Only raise the scoped-VMEM limit when the double-buffered working set
        # actually needs it (keeps defaults for small shapes / all chip gens).
        vmem_need = 4 * (2 * (tm * nin_p + tm * OUT_LANES)
                         + nin_p * h_p + h_p + h_p * OUT_LANES)
        cp_kwargs = dict(dimension_semantics=("parallel",))
        if vmem_need > (24 << 20):
            cp_kwargs["vmem_limit_bytes"] = min(2 * vmem_need, 100 << 20)

        out = pl.pallas_call(
            _fused_nnp_kernel,
            out_shape=jax.ShapeDtypeStruct((n_p, OUT_LANES), jnp.float32),
            grid_spec=pltpu.PrefetchScalarGridSpec(
                num_scalar_prefetch=0,
                grid=grid,
                in_specs=[
                    pl.BlockSpec((tm, nin_p), lambda i: (i, 0)),
                    pl.BlockSpec((nin_p, h_p), lambda i: (0, 0)),
                    pl.BlockSpec((1, h_p), lambda i: (0, 0)),
                    pl.BlockSpec((h_p, OUT_LANES), lambda i: (0, 0)),
                ],
                out_specs=pl.BlockSpec((tm, OUT_LANES), lambda i: (i, 0)),
            ),
            compiler_params=pltpu.CompilerParams(**cp_kwargs),
            cost_estimate=pl.CostEstimate(
                flops=flops,
                transcendentals=n_p * h_p,
                bytes_accessed=bytes_accessed,
            ),
        )(x_p, self.w1_p, self.b1_p, self.wout)

        return out[:n_atoms]  # [n_atoms, 128] (col 0 e_atom, cols 1:4 forces)


# --------------------------------------------------------------------------
# Modules mirroring the NeuralNetworkPotential pipeline
# --------------------------------------------------------------------------
class NodeInputScale:
    """Input module: cheap elementwise input transform (plain JAX, not a hot path)."""
    required_derivatives = None
    model_outputs = None

    def __init__(self, scale: float):
        self.scale = jnp.float32(scale)

    def __call__(self, data, compute_stress=False, compute_virials=False):
        data["node_inputs"] = data["node_inputs"] * self.scale
        return data


class Representation:
    """Representation module.  Runs the fused Pallas kernel once; the fused
    output block (per-atom energy column + force columns) is stashed in `data`
    so the output heads below are pure slicing/reduction."""
    required_derivatives = None
    model_outputs = None

    def __init__(self, core: FusedPotentialCore):
        self.core = core

    def __call__(self, data):
        data["head_block"] = self.core(data["node_inputs"])
        return data


class EnergyOutput:
    """Output module: per-structure energy = sum over atoms of head column 0."""
    required_derivatives = None
    model_outputs = ["CACE_energy"]

    def __call__(self, data, training=False):
        blk = data["head_block"]
        data["CACE_energy"] = jnp.sum(blk[:, 0:1], axis=0, keepdims=True)  # [1, 1]
        return data


class ForcesOutput:
    """Output module: per-atom forces = head columns 1:4."""
    # TODO(synk): real CACE forces are -dE/dpositions via autograd; use jax.grad
    # on the wrapper instead — a linear force head stands in here.
    required_derivatives = ["positions"]
    model_outputs = ["CACE_forces"]

    def __call__(self, data, training=False):
        data["CACE_forces"] = data["head_block"][:, 1:4]                    # [N, 3]
        return data


class EnergyShiftPostprocessor:
    """Postprocessor (Transform stand-in); inactive because do_postprocessing=False."""
    required_derivatives = None
    model_outputs = None

    def __init__(self, shift: float):
        self.shift = jnp.float32(shift)

    def __call__(self, data):
        data["CACE_energy"] = data["CACE_energy"] + self.shift
        return data


class NeuralNetworkPotential:
    """JAX/Pallas version of cace NeuralNetworkPotential."""

    def __init__(self, representation, input_modules: Optional[List] = None,
                 output_modules: Optional[List] = None,
                 postprocessors: Optional[List] = None,
                 do_postprocessing: bool = False):
        self.representation = representation
        self.input_modules = list(input_modules or [])
        self.output_modules = list(output_modules or [])
        self.postprocessors = list(postprocessors or [])
        self.do_postprocessing = do_postprocessing
        self.required_derivatives: List[str] = []
        self.model_outputs: List[str] = []
        self.collect_derivatives()
        self.collect_outputs()

    def _modules(self):
        return ([self] + self.input_modules + [self.representation]
                + self.output_modules + self.postprocessors)

    def collect_derivatives(self):
        req = set()
        for m in self._modules():
            rd = getattr(m, "required_derivatives", None)
            if rd:
                req.update(rd)
        self.required_derivatives = sorted(req)

    def collect_outputs(self):
        outs = set()
        for m in self._modules():
            mo = getattr(m, "model_outputs", None)
            if mo:
                outs.update(mo)
        self.model_outputs = sorted(outs)

    def initialize_derivatives(self, data):
        # TODO(synk): torch requires_grad_ bookkeeping has no Pallas equivalent;
        # derivatives in JAX come from jax.grad on the wrapper function.
        return data

    def postprocess(self, data):
        if self.do_postprocessing:
            for pp in self.postprocessors:
                data = pp(data)
        return data

    def extract_outputs(self, data):
        return {k: data[k] for k in self.model_outputs}

    def __call__(self, data: Dict[str, jnp.ndarray], training: bool = False,
                 compute_stress: bool = False, compute_virials: bool = False):
        data = self.initialize_derivatives(data)
        if "stress" in self.model_outputs or "CACE_stress" in self.model_outputs:
            compute_stress = True
        for m in self.input_modules:
            data = m(data, compute_stress=compute_stress,
                     compute_virials=compute_virials)
        data = self.representation(data)
        for m in self.output_modules:
            data = m(data, training=training)
        data = self.postprocess(data)
        return self.extract_outputs(data)


# --------------------------------------------------------------------------
if __name__ == "__main__":
    key = jax.random.PRNGKey(0)
    k_x, k_pos, k_w1, k_b1, k_we, k_wf = jax.random.split(key, 6)

    n_atoms, n_in, hidden = 16, 16, 32
    node_inputs = jax.random.normal(k_x, (n_atoms, n_in), dtype=jnp.float32)
    positions = jax.random.normal(k_pos, (n_atoms, 3), dtype=jnp.float32)

    w1 = jax.random.normal(k_w1, (n_in, hidden), dtype=jnp.float32) * 0.1
    b1 = jax.random.normal(k_b1, (hidden,), dtype=jnp.float32) * 0.1
    w_e = jax.random.normal(k_we, (hidden, 1), dtype=jnp.float32) * 0.1
    w_f = jax.random.normal(k_wf, (hidden, 3), dtype=jnp.float32) * 0.1

    core = FusedPotentialCore(w1, b1, w_e, w_f)
    model = NeuralNetworkPotential(
        representation=Representation(core),
        input_modules=[NodeInputScale(0.5)],
        output_modules=[EnergyOutput(), ForcesOutput()],
        postprocessors=[EnergyShiftPostprocessor(1.0)],
        do_postprocessing=False,
    )

    data = {"node_inputs": node_inputs, "positions": positions}
    out = model(dict(data))
    jax.block_until_ready(out)

    # Plain-JAX reference of the same forward pass.
    x_s = node_inputs * 0.5
    h = jax.nn.silu(x_s @ w1 + b1)
    e_ref = (h @ w_e).sum()
    f_ref = h @ w_f

    assert set(out.keys()) == {"CACE_energy", "CACE_forces"}
    assert out["CACE_energy"].shape == (1, 1)
    assert out["CACE_forces"].shape == (n_atoms, 3)
    assert jnp.allclose(out["CACE_energy"][0, 0], e_ref, atol=1e-3, rtol=1e-3)
    assert jnp.allclose(out["CACE_forces"], f_ref, atol=1e-3, rtol=1e-3)

    print("KERNEL_OK")
</pallas_src>

<mosaic_0001>
module attributes {stable_mosaic.version = 11 : i64} {
  func.func @_fused_nnp_kernel(%arg0: i32, %arg1: memref<16x128xf32, #tpu.memory_space<vmem>>, %arg2: memref<128x128xf32, #tpu.memory_space<vmem>>, %arg3: memref<1x128xf32, #tpu.memory_space<vmem>>, %arg4: memref<128x128xf32, #tpu.memory_space<vmem>>, %arg5: memref<16x128xf32, #tpu.memory_space<vmem>>) attributes {dimension_semantics = [#tpu.dimension_semantics<parallel>], iteration_bounds = array<i64: 1>, scalar_prefetch = 0 : i64, scratch_operands = 0 : i64, tpu.core_type = #tpu.core_type<tc>, window_params = [{transform_indices = @transform_0, window_bounds = array<i64: 16, 128>}, {pipeline_mode = #tpu.pipeline_mode<synchronous>, transform_indices = @transform_1, window_bounds = array<i64: 128, 128>}, {pipeline_mode = #tpu.pipeline_mode<synchronous>, transform_indices = @transform_2, window_bounds = array<i64: 1, 128>}, {pipeline_mode = #tpu.pipeline_mode<synchronous>, transform_indices = @transform_3, window_bounds = array<i64: 128, 128>}, {transform_indices = @transform_4, window_bounds = array<i64: 16, 128>}]} {
    %c0 = arith.constant 0 : index
    %c0_0 = arith.constant 0 : index
    %0 = vector.load %arg1[%c0, %c0_0] : memref<16x128xf32, #tpu.memory_space<vmem>>, vector<16x128xf32>
    %c0_1 = arith.constant 0 : index
    %c0_2 = arith.constant 0 : index
    %1 = vector.load %arg2[%c0_1, %c0_2] : memref<128x128xf32, #tpu.memory_space<vmem>>, vector<128x128xf32>
    %cst = arith.constant dense<0.000000e+00> : vector<16x128xf32>
    %2 = tpu.matmul %0, %1, %cst {dimension_numbers = #tpu.dot_dimension_numbers<[1], [0], [0], [1], [0, 0, 1, 1], [], []>} : vector<16x128xf32>, vector<128x128xf32>, vector<16x128xf32> -> vector<16x128xf32>
    %c0_3 = arith.constant 0 : index
    %c0_4 = arith.constant 0 : index
    %3 = vector.load %arg3[%c0_3, %c0_4] : memref<1x128xf32, #tpu.memory_space<vmem>>, vector<1x128xf32>
    %4 = vector.broadcast %3 : vector<1x128xf32> to vector<16x128xf32>
    %5 = arith.addf %2, %4 : vector<16x128xf32>
    %6 = arith.negf %5 : vector<16x128xf32>
    %7 = math.exp %6 : vector<16x128xf32>
    %cst_5 = arith.constant 1.000000e+00 : f32
    %8 = vector.broadcast %cst_5 : f32 to vector<16x128xf32>
    %9 = arith.addf %8, %7 : vector<16x128xf32>
    %10 = arith.divf %8, %9 : vector<16x128xf32>
    %11 = arith.mulf %5, %10 : vector<16x128xf32>
    %c0_6 = arith.constant 0 : index
    %c0_7 = arith.constant 0 : index
    %12 = vector.load %arg4[%c0_6, %c0_7] : memref<128x128xf32, #tpu.memory_space<vmem>>, vector<128x128xf32>
    %cst_8 = arith.constant dense<0.000000e+00> : vector<16x128xf32>
    %13 = tpu.matmul %11, %12, %cst_8 {dimension_numbers = #tpu.dot_dimension_numbers<[1], [0], [0], [1], [0, 0, 1, 1], [], []>} : vector<16x128xf32>, vector<128x128xf32>, vector<16x128xf32> -> vector<16x128xf32>
    %c0_9 = arith.constant 0 : index
    %c0_10 = arith.constant 0 : index
    %14 = vector.load %arg5[%c0_9, %c0_10] : memref<16x128xf32, #tpu.memory_space<vmem>>, vector<16x128xf32>
    tpu.vector_store %arg5[%c0_9, %c0_10], %13 {strides = array<i32>} : memref<16x128xf32, #tpu.memory_space<vmem>>, vector<16x128xf32>,
    return
  }
  func.func @transform_0(%arg0: i32) -> (i32, i32) {
    %c0_i32 = arith.constant 0 : i32
    %c0_i32_0 = arith.constant 0 : i32
    return %arg0, %c0_i32 : i32, i32
  }
  func.func @transform_1(%arg0: i32) -> (i32, i32) {
    %c0_i32 = arith.constant 0 : i32
    %c0_i32_0 = arith.constant 0 : i32
    %c0_i32_1 = arith.constant 0 : i32
    return %c0_i32, %c0_i32_0 : i32, i32
  }
  func.func @transform_2(%arg0: i32) -> (i32, i32) {
    %c0_i32 = arith.constant 0 : i32
    %c0_i32_0 = arith.constant 0 : i32
    %c0_i32_1 = arith.constant 0 : i32
    return %c0_i32, %c0_i32_0 : i32, i32
  }
  func.func @transform_3(%arg0: i32) -> (i32, i32) {
    %c0_i32 = arith.constant 0 : i32
    %c0_i32_0 = arith.constant 0 : i32
    %c0_i32_1 = arith.constant 0 : i32
    return %c0_i32, %c0_i32_0 : i32, i32
  }
  func.func @transform_4(%arg0: i32) -> (i32, i32) {
    %c0_i32 = arith.constant 0 : i32
    %c0_i32_0 = arith.constant 0 : i32
    return %arg0, %c0_i32 : i32, i32
  }
}

</mosaic_0001>

<bundles_post_ra>
// kernel: tpu_custom_call.1
= control target key start
LH: loop header
LB: loop body
LE: loop exit
PB: predicated region body
PF: predicated region fallthrough
CT: control target
= control target key end

     0   :  { %9 = vsyncpa [#allocation3], 0  ;;  %s551_s0 = inlined_call_operand.hbm [shape: f32[16,128], index: 0, kind: input, shape index: {}]   ;;  %s552_s1 = inlined_call_operand.hbm [shape: f32[128,128], index: 1, kind: input, shape index: {}]   ;;  %s553_s2 = inlined_call_operand.vmem [shape: f32[1,128], index: 2, kind: input, shape index: {}]   ;;  %s554_s3 = inlined_call_operand.hbm [shape: f32[128,128], index: 3, kind: input, shape index: {}]   ;;  %s555_s4 = inlined_call_operand.hbm [shape: f32[16,128], index: 4, kind: output, shape index: {}]  }
   0x1   :  { %10 = vsyncpa [#allocation6], 0 }
   0x2   :  { %11 = vsyncpa [#allocation4], 0  ;;  %s493_s15 = smov [#allocation5]   ;;  %s494_s17 = smov [#allocation2]  }
   0x3   :  { %s29_s16 = sshll.u32 %s493_s15, 4  ;;  %s17_s18 = sshll.u32 %s494_s17, 4  ;;  %s30_s16 = int_to_ptr.vmem [resolvable:$true] %s29_s16  ;;  %s18_s18 = int_to_ptr.vmem [resolvable:$true] %s17_s18 }
   0x4   :  { %s415_s19 = scalar_lea.vmem %s30_s16, 2048  ;;  %p420_p1 = scmp.lt.s32.totalorder %s30_s16, %s30_s16 }
   0x5   :  { %p416_p0 = scmp.ne.s32.totalorder %s30_s16, %s415_s19  ;;  %p421_p2 = scmp.lt.s32.totalorder %s415_s19, %s415_s19 }
   0x7   :  { %p422_p3 = por %p421_p2, %p420_p1 }
   0x9   :  { %p423_p4 = pnand %p422_p3, %p416_p0 }
   0xb   :  { %426 = shalt.err (!%p423_p4)
}
   0xc   :  { %s495_s20 = smov 128   ;;  %s496_s21 = smov 8  }
   0xd   :  { %35 = dma.hbm_to_vmem [thread:$0]  %s552_s1, 2048, %s30_s16, [#allocation6], %s495_s20, %s495_s20, %s496_s21  }
   0xe   :  { %s435_s24 = scalar_lea.vmem %s18_s18, 256  ;;  %p440_p6 = scmp.lt.s32.totalorder %s18_s18, %s18_s18 }
   0xf   :  { %p436_p5 = scmp.ne.s32.totalorder %s18_s18, %s435_s24  ;;  %p441_p7 = scmp.lt.s32.totalorder %s435_s24, %s435_s24 }
  0x11   :  { %p442_p8 = por %p441_p7, %p440_p6 }
  0x13   :  { %p443_p9 = pnand %p442_p8, %p436_p5 }
  0x15   :  { %446 = shalt.err (!%p443_p9)
}
  0x16   :  { %23 = dma.hbm_to_vmem [thread:$0]  %s551_s0, 256, %s18_s18, [#allocation3], %s495_s20, %s495_s20, %s496_s21  }
  0x17   :  { %s497_s27 = smov [#allocation7]  }
  0x18   :  { %s43_s28 = sshll.u32 %s497_s27, 4  ;;  %s44_s28 = int_to_ptr.vmem [resolvable:$true] %s43_s28 }
  0x19   :  { %s455_s29 = scalar_lea.vmem %s44_s28, 2048  ;;  %p460_p11 = scmp.lt.s32.totalorder %s44_s28, %s44_s28 }
  0x1a   :  { %p456_p10 = scmp.ne.s32.totalorder %s44_s28, %s455_s29  ;;  %p461_p12 = scmp.lt.s32.totalorder %s455_s29, %s455_s29 }
  0x1c   :  { %p462_p13 = por %p461_p12, %p460_p11 }
  0x1e   :  { %p463_p0 = pnand %p462_p13, %p456_p10 }
  0x20   :  { %466 = shalt.err (!%p463_p0)
}
  0x21   :  { %49 = dma.hbm_to_vmem [thread:$0]  %s554_s3, 2048, %s44_s28, [#allocation6], %s495_s20, %s495_s20, %s496_s21  }
  0x22   :  { %487 = dma.done.wait [#allocation3], 256  }
  0x23   :  { %488 = vsyncadd [#allocation3], 4294967040 }
  0x24   :  { %489 = dma.done.wait [#allocation6], 4096  }
  0x25   :  { %490 = vsyncadd [#allocation6], 4294963200  ;;  %v76_v0 = vld [vmem:[#allocation5 + $0x78] sm:$0xff]  ;;  %v75_v1 = vld [vmem:[#allocation5 + $0x70] sm:$0xff] }
  0x26   :  { %323 = vmatprep.subr.mxu0 %v76_v0  ;;  %v74_v2 = vld [vmem:[#allocation5 + $0x68] sm:$0xff]  ;;  %v73_v3 = vld [vmem:[#allocation5 + $0x60] sm:$0xff]  ;;  %v59_v4 = vld [vmem:[#allocation2] sm:$0xff] }
  0x27   :  { %324 = vmatpush3.msra.mxu0 %v76_v0  ;;  %v72_v5 = vld [vmem:[#allocation5 + $0x58] sm:$0xff]  ;;  %355 = vmatprep.mubr.f32.mxu0 %v59_v4  ;;  %v71_v6 = vld [vmem:[#allocation5 + $0x50] sm:$0xff]  ;;  %v70_v7 = vld [vmem:[#allocation5 + $0x48] sm:$0xff] }
  0x28   :  { %325 = vmatprep.subr.mxu0 %v75_v1  ;;  %v69_v8 = vld [vmem:[#allocation5 + $0x40] sm:$0xff]  ;;  %v68_v9 = vld [vmem:[#allocation5 + $0x38] sm:$0xff]  ;;  %v67_v10 = vld [vmem:[#allocation5 + $0x30] sm:$0xff] }
  0x29   :  { %326 = vmatpush3.msra.mxu0 %v75_v1  ;;  %v66_v11 = vld [vmem:[#allocation5 + $0x28] sm:$0xff]  ;;  %v65_v12 = vld [vmem:[#allocation5 + $0x20] sm:$0xff]  ;;  %v64_v13 = vld [vmem:[#allocation5 + $0x18] sm:$0xff] }
  0x2a   :  { %327 = vmatprep.subr.mxu0 %v74_v2  ;;  %v63_v14 = vld [vmem:[#allocation5 + $0x10] sm:$0xff]  ;;  %v62_v15 = vld [vmem:[#allocation5 + $0x8] sm:$0xff]  ;;  %v61_v16 = vld [vmem:[#allocation5] sm:$0xff] }
  0x2b   :  { %328 = vmatpush3.msra.mxu0 %v74_v2  ;;  %v60_v17 = vld [vmem:[#allocation2 + $0x8] sm:$0xff]  ;;  %v187_v19 = vld [vmem:[#allocation7 + $0x70] sm:$0xff]  ;;  %v186_v20 = vld [vmem:[#allocation7 + $0x68] sm:$0xff] }
  0x2c   :  { %329 = vmatprep.subr.mxu0 %v73_v3  ;;  %v188_v18 = vld [vmem:[#allocation7 + $0x78] sm:$0xff]  ;;  %v185_v21 = vld [vmem:[#allocation7 + $0x60] sm:$0xff]  ;;  %v183_v23 = vld [vmem:[#allocation7 + $0x50] sm:$0xff] }
  0x2d   :  { %330 = vmatpush3.msra.mxu0 %v73_v3  ;;  %358 = vmatprep.subr.mxu1 %v188_v18  ;;  %v184_v22 = vld [vmem:[#allocation7 + $0x58] sm:$0xff]  ;;  %v182_v24 = vld [vmem:[#allocation7 + $0x48] sm:$0xff]  ;;  %v181_v25 = vld [vmem:[#allocation7 + $0x40] sm:$0xff] }
  0x2e   :  { %331 = vmatprep.subr.mxu0 %v72_v5  ;;  %359 = vmatpush3.msra.mxu1 %v188_v18  ;;  %v180_v26 = vld [vmem:[#allocation7 + $0x38] sm:$0xff]  ;;  %v179_v27 = vld [vmem:[#allocation7 + $0x30] sm:$0xff]  ;;  %v178_v28 = vld [vmem:[#allocation7 + $0x28] sm:$0xff] }
  0x2f   :  { %332 = vmatpush3.msra.mxu0 %v72_v5  ;;  %360 = vmatprep.subr.mxu1 %v187_v19  ;;  %v177_v29 = vld [vmem:[#allocation7 + $0x20] sm:$0xff]  ;;  %v176_v30 = vld [vmem:[#allocation7 + $0x18] sm:$0xff]  ;;  %v175_v31 = vld [vmem:[#allocation7 + $0x10] sm:$0xff] }
  0x30   :  { %333 = vmatprep.subr.mxu0 %v71_v6  ;;  %361 = vmatpush3.msra.mxu1 %v187_v19  ;;  %v174_v32 = vld [vmem:[#allocation7 + $0x8] sm:$0xff]  ;;  %v173_v33 = vld [vmem:[#allocation7] sm:$0xff]  ;;  %v284_v34 = vld [vmem:[%s553_s2] ss:$0 sm:$0xff]  ;;  %s498_s2 = smov [#allocation8]  }
  0x31   :  { %334 = vmatpush3.msra.mxu0 %v71_v6  ;;  %362 = vmatprep.subr.mxu1 %v186_v20  ;;  %s271_s5 = sshll.u32 %s498_s2, 4  ;;  %s272_s5 = int_to_ptr.vmem [resolvable:$true] %s271_s5 }
  0x32   :  { %335 = vmatprep.subr.mxu0 %v70_v7  ;;  %363 = vmatpush3.msra.mxu1 %v186_v20  ;;  %s467_s6 = scalar_lea.vmem %s272_s5, 256  ;;  %p472_p2 = scmp.lt.s32.totalorder %s272_s5, %s272_s5 }
  0x33   :  { %336 = vmatpush3.msra.mxu0 %v70_v7  ;;  %364 = vmatprep.subr.mxu1 %v185_v21  ;;  %p468_p1 = scmp.ne.s32.totalorder %s272_s5, %s467_s6  ;;  %p473_p3 = scmp.lt.s32.totalorder %s467_s6, %s467_s6 }
  0x34   :  { %337 = vmatprep.subr.mxu0 %v69_v8  ;;  %365 = vmatpush3.msra.mxu1 %v185_v21 }
  0x35   :  { %338 = vmatpush3.msra.mxu0 %v69_v8  ;;  %366 = vmatprep.subr.mxu1 %v184_v22  ;;  %p474_p4 = por %p473_p3, %p472_p2 }
  0x36   :  { %339 = vmatprep.subr.mxu0 %v68_v9  ;;  %367 = vmatpush3.msra.mxu1 %v184_v22 }
  0x37   :  { %340 = vmatpush3.msra.mxu0 %v68_v9  ;;  %368 = vmatprep.subr.mxu1 %v183_v23  ;;  %p475_p5 = pnand %p474_p4, %p468_p1 }
  0x38   :  { %341 = vmatprep.subr.mxu0 %v67_v10  ;;  %369 = vmatpush3.msra.mxu1 %v183_v23 }
  0x39   :  { %342 = vmatpush3.msra.mxu0 %v67_v10  ;;  %370 = vmatprep.subr.mxu1 %v182_v24 }
  0x3a   :  { %343 = vmatprep.subr.mxu0 %v66_v11  ;;  %371 = vmatpush3.msra.mxu1 %v182_v24 }
  0x3b   :  { %344 = vmatpush3.msra.mxu0 %v66_v11  ;;  %372 = vmatprep.subr.mxu1 %v181_v25 }
  0x3c   :  { %345 = vmatprep.subr.mxu0 %v65_v12  ;;  %373 = vmatpush3.msra.mxu1 %v181_v25 }
  0x3d   :  { %346 = vmatpush3.msra.mxu0 %v65_v12  ;;  %374 = vmatprep.subr.mxu1 %v180_v26 }
  0x3e   :  { %347 = vmatprep.subr.mxu0 %v64_v13  ;;  %375 = vmatpush3.msra.mxu1 %v180_v26 }
  0x3f   :  { %348 = vmatpush3.msra.mxu0 %v64_v13  ;;  %376 = vmatprep.subr.mxu1 %v179_v27 }
  0x40   :  { %349 = vmatprep.subr.mxu0 %v63_v14  ;;  %377 = vmatpush3.msra.mxu1 %v179_v27 }
  0x41   :  { %350 = vmatpush3.msra.mxu0 %v63_v14  ;;  %378 = vmatprep.subr.mxu1 %v178_v28 }
  0x42   :  { %351 = vmatprep.subr.mxu0 %v62_v15  ;;  %379 = vmatpush3.msra.mxu1 %v178_v28 }
  0x43   :  { %352 = vmatpush3.msra.mxu0 %v62_v15  ;;  %380 = vmatprep.subr.mxu1 %v177_v29 }
  0x44   :  { %353 = vmatprep.subr.mxu0 %v61_v16  ;;  %381 = vmatpush3.msra.mxu1 %v177_v29 }
  0x45   :  { %354 = vmatpush3.msra.mxu0 %v61_v16  ;;  %382 = vmatprep.subr.mxu1 %v176_v30 }
  0x46   :  { %356 = vmatmul.mubr.f32.vlgmr.msra.gmra.mxu0 %v60_v17  ;;  %383 = vmatpush3.msra.mxu1 %v176_v30 }
  0x47   :  { %384 = vmatprep.subr.mxu1 %v175_v31 }
  0x48   :  { %385 = vmatpush3.msra.mxu1 %v175_v31 }
  0x49   :  { %386 = vmatprep.subr.mxu1 %v174_v32 }
  0x4a   :  { %387 = vmatpush3.msra.mxu1 %v174_v32 }
  0x4b   :  { %388 = vmatprep.subr.mxu1 %v173_v33 }
  0x4c   :  { %389 = vmatpush3.msra.mxu1 %v173_v33 }
 0x106   :  { %v357_v35 = vpop.f32.mrf.mxu0 }
 0x107   :  { %v156_v36 = vadd.f32 %v357_v35, %v284_v34 }
 0x108   :  { %v150_v37 = vpop.f32.mrf.mxu0 }
 0x109   :  { %v286_v38 = vmul.f32 -1.442695, %v156_v36  ;;  %v151_v39 = vadd.f32 %v284_v34, %v150_v37 }
 0x10b   :  { %399 = vpow2.f32 %v286_v38  ;;  %v285_v40 = vmul.f32 -1.442695, %v151_v39 }
 0x10d   :  { %401 = vpow2.f32 %v285_v40 }
 0x118   :  { %v400_v41 = vpop.eup %399 }
 0x119   :  { %v166_v42 = vadd.f32 1.0, %v400_v41 }
 0x11a   :  { %v402_v43 = vpop.eup %401 }
 0x11b   :  { %v165_v44 = vadd.f32 1.0, %v402_v43  ;;  %403 = vrcp.f32 %v166_v42 }
 0x11d   :  { %405 = vrcp.f32 %v165_v44 }
 0x128   :  { %v404_v45 = vpop.eup %403 }
 0x129   :  { %v172_v48 = vmul.f32 %v404_v45, %v156_v36 }
 0x12a   :  { %v406_v46 = vpop.eup %405 }
 0x12b   :  { %v171_v47 = vmul.f32 %v406_v46, %v151_v39 }
 0x12d   :  { %390 = vmatprep.mubr.f32.mxu1 %v171_v47 }
 0x12e   :  { %391 = vmatmul.mubr.f32.vlgmr.msra.gmra.mxu1 %v172_v48 }
 0x1ee   :  { %v392_v49 = vpop.f32.mrf.mxu1 }
 0x1ef   :  { %265 = vst [vmem:[#allocation8 + $0x8] sm:$0xff] %v392_v49 }
 0x1f0   :  { %v255_v50 = vpop.f32.mrf.mxu1 }
 0x1f1   :  { %264 = vst [vmem:[#allocation8] sm:$0xff] %v255_v50 }
 0x1f2   :  { %478 = shalt.err (!%p475_p5)
}
 0x1f3   :  { %277 = dma.vmem_to_hbm [thread:$0]  %s272_s5, 256, %s555_s4, [#allocation4], %s495_s20, %s495_s20, %s496_s21  }
 0x1f4   :  { %491 = dma.done.wait [#allocation4], 256  }
 0x1f5   :  { %492 = vsyncadd [#allocation4], 4294967040 }
 0x1f6   :  { %281 = vsyncpa [#allocation3], 1 }
 0x1f7   :  { %282 = vsyncpa [#allocation6], 1 }
 0x1f8   :  { %283 = vsyncpa [#allocation4], 1 }

</bundles_post_ra>
